<compile_context>
chip_gen: v7x
topology: tpu7x:2x2x1
jax: 0.10.0
libtpu: 0.0.40
codegen_flags: <defaults>
</compile_context>

<pallas_src>
import math

import jax
import jax.numpy as jnp
import numpy as np
from jax.experimental import pallas as pl
from jax.experimental.pallas import tpu as pltpu


def _identity_kernel(logits_ref, out_ref):
    # Abstract forward => identity over the logits tile (pure VPU copy).
    out_ref[...] = logits_ref[...]


# Per-block byte budget. 2 operands x 2 pipeline buffers x 2 MiB = 8 MiB,
# which fits comfortably under the scoped-VMEM defaults on v5e/v6e (32/16 MiB)
# and v7x (32 MiB of 64 MiB physical).
_TILE_BYTES_BUDGET = 2 * 1024 * 1024


def _tiled_identity_2d(x2d: jnp.ndarray) -> jnp.ndarray:
    """Pipelined, aliased identity over a lane/sublane-aligned 2-D slab."""
    rows, cols = x2d.shape
    row_bytes = cols * x2d.dtype.itemsize
    tile_rows = max(8, (_TILE_BYTES_BUDGET // row_bytes) // 8 * 8)
    tile_rows = min(tile_rows, rows)
    grid = (pl.cdiv(rows, tile_rows),)
    return pl.pallas_call(
        _identity_kernel,
        out_shape=jax.ShapeDtypeStruct(x2d.shape, x2d.dtype),
        grid=grid,
        in_specs=[pl.BlockSpec((tile_rows, cols), lambda i: (i, 0))],
        out_specs=pl.BlockSpec((tile_rows, cols), lambda i: (i, 0)),
        input_output_aliases={0: 0},
        compiler_params=pltpu.CompilerParams(
            dimension_semantics=("parallel",),
        ),
    )(x2d)


def _whole_array_identity_2d(x2d: jnp.ndarray) -> jnp.ndarray:
    """Fallback for shapes that are not (8,128)-alignable: one full block."""
    return pl.pallas_call(
        _identity_kernel,
        out_shape=jax.ShapeDtypeStruct(x2d.shape, x2d.dtype),
        in_specs=[
            pl.BlockSpec(
                x2d.shape, lambda: (0, 0), memory_space=pltpu.MemorySpace.VMEM
            )
        ],
        out_specs=pl.BlockSpec(
            x2d.shape, lambda: (0, 0), memory_space=pltpu.MemorySpace.VMEM
        ),
        input_output_aliases={0: 0},
    )(x2d)


def classifier_head_forward(logits: jnp.ndarray) -> jnp.ndarray:
    """ClassifierHead.forward — abstract in the reference, so a pass-through.

    The Pallas kernel boundary is kept but made as close to free as possible:
    the output aliases the input, the copy is tiled & pipelined over rows, and
    the kernel is presented a lane-dense (multiple-of-128 last dim) slab
    whenever the element count allows it.
    """
    shape = logits.shape
    if logits.ndim == 0:
        return _whole_array_identity_2d(logits.reshape(1, 1)).reshape(shape)

    cols = shape[-1]
    rows = math.prod(shape[:-1]) if len(shape) > 1 else 1
    total = rows * cols
    x2d = logits.reshape(rows, cols)

    if cols % 128 == 0 and rows % 8 == 0:
        out = _tiled_identity_2d(x2d)
    elif total % (8 * 128) == 0:
        # Re-flatten to a lane-dense slab (pure elementwise copy, so the row
        # structure is irrelevant inside the kernel).
        out = _tiled_identity_2d(x2d.reshape(total // 128, 128))
        out = out.reshape(rows, cols)
    else:
        out = _whole_array_identity_2d(x2d)

    return out.reshape(shape)


if __name__ == "__main__":
    key = jax.random.PRNGKey(0)

    # Small but layout-realistic logits: 8 rows (full sublanes) x 256 classes
    # (lane-dense, 2 x 128).
    batch, num_classes = 8, 256
    logits = jax.random.normal(key, (batch, num_classes), dtype=jnp.float32)

    # Host copy for the correctness check — the device buffer is donated below
    # so the aliasing actually eliminates the round-trip.
    expected = jax.device_get(logits)

    fwd = jax.jit(classifier_head_forward, donate_argnums=0)
    out = jax.block_until_ready(fwd(logits))

    assert out.shape == expected.shape and out.dtype == expected.dtype
    assert np.array_equal(np.asarray(jax.device_get(out)), expected)

    # Also exercise the non-aligned fallback path (original tiny demo shape).
    small = jax.random.normal(jax.random.PRNGKey(1), (2, 32), dtype=jnp.float32)
    out_small = jax.block_until_ready(classifier_head_forward(small))
    assert np.allclose(np.asarray(out_small), np.asarray(small))

    print("KERNEL_OK")
</pallas_src>

<mosaic_0001>
module attributes {stable_mosaic.version = 11 : i64} {
  func.func @_identity_kernel(%arg0: i32, %arg1: memref<8x256xf32, #tpu.memory_space<vmem>>, %arg2: memref<8x256xf32, #tpu.memory_space<vmem>>) attributes {dimension_semantics = [#tpu.dimension_semantics<parallel>], iteration_bounds = array<i64: 1>, scalar_prefetch = 0 : i64, scratch_operands = 0 : i64, tpu.core_type = #tpu.core_type<tc>, window_params = [{transform_indices = @transform_0, window_bounds = array<i64: 8, 256>}, {transform_indices = @transform_1, window_bounds = array<i64: 8, 256>}]} {
    %c0 = arith.constant 0 : index
    %c0_0 = arith.constant 0 : index
    %0 = vector.load %arg1[%c0, %c0_0] : memref<8x256xf32, #tpu.memory_space<vmem>>, vector<8x256xf32>
    %c0_1 = arith.constant 0 : index
    %c0_2 = arith.constant 0 : index
    %1 = vector.load %arg2[%c0_1, %c0_2] : memref<8x256xf32, #tpu.memory_space<vmem>>, vector<8x256xf32>
    tpu.vector_store %arg2[%c0_1, %c0_2], %0 {strides = array<i32>} : memref<8x256xf32, #tpu.memory_space<vmem>>, vector<8x256xf32>,
    return
  }
  func.func @transform_0(%arg0: i32) -> (i32, i32) {
    %c0_i32 = arith.constant 0 : i32
    %c0_i32_0 = arith.constant 0 : i32
    return %arg0, %c0_i32 : i32, i32
  }
  func.func @transform_1(%arg0: i32) -> (i32, i32) {
    %c0_i32 = arith.constant 0 : i32
    %c0_i32_0 = arith.constant 0 : i32
    return %arg0, %c0_i32 : i32, i32
  }
}

</mosaic_0001>

<bundles_post_ra>
// kernel: classifier_head_forward.1
= control target key start
LH: loop header
LB: loop body
LE: loop exit
PB: predicated region body
PF: predicated region fallthrough
CT: control target
= control target key end

     0   :  { %6 = vsyncpa [#allocation3], 0  ;;  %s126_s0 = inlined_call_operand.hbm [shape: f32[8,256], index: 0, kind: input, shape index: {}, may-alias: {0,1}]   ;;  %s127_s1 = inlined_call_operand.hbm [shape: f32[8,256], index: 1, kind: output, shape index: {}, may-alias: {0,1}]  }
   0x1   :  { %7 = vsyncpa [#allocation4], 0  ;;  %s90_s6 = smov [#allocation2]   ;;  %s42_s10 = scalar_lea.hbm %s126_s0, 256 }
   0x2   :  { %s14_s7 = sshll.u32 %s90_s6, 4  ;;  %p43_p0 = scmp.ne.s32.totalorder %s126_s0, %s42_s10  ;;  %s15_s7 = int_to_ptr.vmem [resolvable:$true] %s14_s7 }
   0x3   :  { %p46_p1 = scmp.lt.u32.totalorder %s42_s10, %s126_s0 }
   0x5   :  { %p48_p2 = pnand %p46_p1, %p43_p0 }
   0x7   :  { %51 = shalt.err (!%p48_p2)
}
   0x8   :  { %s52_s15 = scalar_lea.vmem %s15_s7, 256  ;;  %p57_p4 = scmp.lt.s32.totalorder %s15_s7, %s15_s7 }
   0x9   :  { %p53_p3 = scmp.ne.s32.totalorder %s15_s7, %s52_s15  ;;  %p58_p5 = scmp.lt.s32.totalorder %s52_s15, %s52_s15 }
   0xb   :  { %p59_p6 = por %p58_p5, %p57_p4 }
   0xd   :  { %p60_p7 = pnand %p59_p6, %p53_p3 }
   0xf   :  { %63 = shalt.err (!%p60_p7)
}
  0x10   :  { %17 = dma.hbm_to_vmem [thread:$0]  %s126_s0, 256, %s15_s7, [#allocation3]  }
  0x11   :  { %86 = dma.done.wait [#allocation3], 256  }
  0x12   :  { %87 = vsyncadd [#allocation3], 4294967040  ;;  %s91_s18 = smov [#allocation5]   ;;  %v21_v0 = vld [vmem:[#allocation2] sm:$0xff]  ;;  %v22_v1 = vld [vmem:[#allocation2 + $0x8] sm:$0xff] }
  0x13   :  { %s31_s19 = sshll.u32 %s91_s18, 4  ;;  %23 = vst [vmem:[#allocation5] sm:$0xff] %v21_v0  ;;  %24 = vst [vmem:[#allocation5 + $0x8] sm:$0xff] %v22_v1  ;;  %s32_s19 = int_to_ptr.vmem [resolvable:$true] %s31_s19 }
  0x14   :  { %s64_s20 = scalar_lea.vmem %s32_s19, 256  ;;  %p69_p9 = scmp.lt.s32.totalorder %s32_s19, %s32_s19 }
  0x15   :  { %p65_p8 = scmp.ne.s32.totalorder %s32_s19, %s64_s20  ;;  %p70_p10 = scmp.lt.s32.totalorder %s64_s20, %s64_s20 }
  0x17   :  { %p71_p11 = por %p70_p10, %p69_p9 }
  0x19   :  { %p72_p12 = pnand %p71_p11, %p65_p8 }
  0x1b   :  { %75 = shalt.err (!%p72_p12)
}
  0x1c   :  { %s76_s0 = scalar_lea.hbm %s127_s1, 256 }
  0x1d   :  { %p77_p13 = scmp.ne.s32.totalorder %s127_s1, %s76_s0  ;;  %p80_p0 = scmp.lt.u32.totalorder %s76_s0, %s127_s1 }
  0x1f   :  { %p82_p1 = pnand %p80_p0, %p77_p13 }
  0x21   :  { %85 = shalt.err (!%p82_p1)
}
  0x22   :  { %34 = dma.vmem_to_hbm [thread:$0]  %s32_s19, 256, %s127_s1, [#allocation4]  }
  0x23   :  { %88 = dma.done.wait [#allocation4], 256  }
  0x24   :  { %89 = vsyncadd [#allocation4], 4294967040 }
  0x25   :  { %38 = vsyncpa [#allocation3], 1 }
  0x26   :  { %39 = vsyncpa [#allocation4], 1 }

</bundles_post_ra>
